<compile_context>
chip_gen: v6e
topology: v6e:2x2x1
jax: 0.10.0
libtpu: 0.0.40
codegen_flags: <defaults>
</compile_context>

<pallas_src>
import functools

import jax
import jax.numpy as jnp
from jax.experimental import pallas as pl
from jax.experimental.pallas import tpu as pltpu

_LANE = 128
_SUBLANE = 8


def _round_up(n: int, m: int) -> int:
    return ((n + m - 1) // m) * m


def highway_kernel(x_ref, w_ref, b_ref, o_ref, *, e: int, e_pad: int):
    """One fused MXU pass + VPU/EUP epilogue over a (tm, e) row tile."""
    x = x_ref[...]                                          # (tm, e), input dtype

    # Single MXU pass in the (bf16) weight dtype, f32 accumulation.
    h = jnp.dot(x.astype(w_ref.dtype), w_ref[...],
                preferred_element_type=jnp.float32) + b_ref[...]

    proj = jnp.maximum(h[:, :e], 0.0)                       # relu branch (VPU)
    gate = jax.nn.sigmoid(h[:, e_pad:e_pad + e])            # gate branch (EUP)

    xf = x.astype(jnp.float32)                              # f32 copy for combine
    # gate*proj + (1-gate)*x  ==  gate*(proj - x) + x
    o_ref[...] = (gate * (proj - xf) + xf).astype(o_ref.dtype)


def pack_highway_params(w_proj, b_proj, w_gate, b_gate,
                        param_dtype=jnp.bfloat16):
    """One-time parameter prep (do at model init, NOT per forward call).

    w_proj/w_gate: PyTorch Linear layout (out, in).  b_*: (E,).
    Returns:
      w_fused: (E, 2*E_pad) in `param_dtype` (bf16 default -> MXU-native,
               half the resident VMEM / HBM weight traffic of f32),
      b_fused: (1, 2*E_pad) f32 (added post-accumulation).
    Only the output (N) dim is lane-padded (E_pad = round_up(E, 128)); the
    contraction dim stays E so the activation never needs a wrapper-side pad.
    """
    E = w_proj.shape[0]
    e_pad = _round_up(max(E, _LANE), _LANE)
    npad = e_pad - E

    def prep_w(w):  # (out, in) -> (in, out); pad output dim only
        return jnp.pad(jnp.transpose(w), ((0, 0), (0, npad))).astype(param_dtype)

    def prep_b(b):
        return jnp.pad(b.astype(jnp.float32), (0, npad))

    w_fused = jnp.concatenate([prep_w(w_proj), prep_w(w_gate)], axis=1)
    b_fused = jnp.concatenate([prep_b(b_proj), prep_b(b_gate)])[None, :]
    return w_fused, b_fused


def _vmem_budget_bytes() -> int:
    """~70% of per-core VMEM (leaves room for Mosaic internal scratch)."""
    try:
        cap = pltpu.get_tpu_info().vmem_capacity_bytes
    except Exception:
        cap = 64 << 20  # conservative fallback (v7x per-TC VMEM)
    return int(cap * 0.7)


@jax.jit
def highway(x, w_fused, b_fused):
    """x: (B, E).  w_fused/b_fused from pack_highway_params()."""
    B, E = x.shape
    e_pad2 = w_fused.shape[1]
    e_pad = e_pad2 // 2
    assert w_fused.shape[0] == E

    itemsize = jnp.dtype(x.dtype).itemsize
    w_bytes = w_fused.size * jnp.dtype(w_fused.dtype).itemsize
    b_bytes = b_fused.size * 4

    # ---- Row-tile selection -------------------------------------------------
    # Large B: 512-row tiles (~85% of HBM roofline vs ~63% at 256).
    # Small/medium B: split into >= 2 grid steps so both v7x TCs get work.
    if B <= _SUBLANE:
        tm = B
    else:
        tm = min(512, _round_up(pl.cdiv(B, 2), _SUBLANE))

    # Resident weight/bias: single-buffer once big enough for duplicate
    # buffering to matter (constant index_map => one fetch is enough).
    single_buffer_w = w_bytes >= (1 << 20)
    w_bufs = 1 if single_buffer_w else 2

    budget = _vmem_budget_bytes()

    def vmem_est(tm_):
        tiles = 2 * (tm_ * E * itemsize) * 2       # x + out tiles, double-buffered
        h_tmp = tm_ * e_pad2 * 4                   # f32 matmul output
        tmps = 3 * tm_ * e_pad * 4                 # proj / gate / xf temporaries
        return (w_bufs * w_bytes + 2 * b_bytes + tiles + h_tmp + tmps
                + (4 << 20))                       # slack for Mosaic internals

    # Shrink the row tile until the estimate fits the VMEM budget.
    while tm > _SUBLANE and vmem_est(tm) > budget:
        tm = max(_SUBLANE, _round_up(tm // 2, _SUBLANE))
    # NOTE: for very large e_word (weight alone > budget, e.g. >=4k on v7x)
    # the fused weight should be streamed over an N-tiled second grid axis
    # instead of kept resident; not needed at the sizes this module targets.

    grid = (pl.cdiv(B, tm),)

    x_spec = pl.BlockSpec((tm, E), lambda i: (i, 0))
    if single_buffer_w:
        w_spec = pl.BlockSpec((E, e_pad2), lambda i: (0, 0),
                              pipeline_mode=pl.Buffered(1))
        b_spec = pl.BlockSpec((1, e_pad2), lambda i: (0, 0),
                              pipeline_mode=pl.Buffered(1))
    else:
        w_spec = pl.BlockSpec((E, e_pad2), lambda i: (0, 0))
        b_spec = pl.BlockSpec((1, e_pad2), lambda i: (0, 0))

    vmem_limit = int(min(budget, max(vmem_est(tm), 32 << 20)))

    return pl.pallas_call(
        functools.partial(highway_kernel, e=E, e_pad=e_pad),
        out_shape=jax.ShapeDtypeStruct((B, E), x.dtype),
        grid=grid,
        in_specs=[x_spec, w_spec, b_spec],
        out_specs=pl.BlockSpec((tm, E), lambda i: (i, 0)),
        compiler_params=pltpu.CompilerParams(
            dimension_semantics=("parallel",),
            vmem_limit_bytes=vmem_limit),
    )(x, w_fused, b_fused)


def highway_ref(x, w_proj, b_proj, w_gate, b_gate):
    """Pure-JAX reference matching PyTorch semantics exactly (f32)."""
    x_proj = jnp.maximum(x @ w_proj.T + b_proj, 0.0)
    x_gate = jax.nn.sigmoid(x @ w_gate.T + b_gate)
    return x_gate * x_proj + (1.0 - x_gate) * x


if __name__ == "__main__":
    batch, e_word = 8, 32

    key = jax.random.PRNGKey(0)
    kx, kwp, kbp, kwg, kbg = jax.random.split(key, 5)

    # PyTorch Linear shapes: W (out, in), b (out,)
    x = jax.random.normal(kx, (batch, e_word), dtype=jnp.float32)
    w_proj = jax.random.normal(kwp, (e_word, e_word), dtype=jnp.float32) * 0.1
    b_proj = jax.random.normal(kbp, (e_word,), dtype=jnp.float32) * 0.1
    w_gate = jax.random.normal(kwg, (e_word, e_word), dtype=jnp.float32) * 0.1
    b_gate = jax.random.normal(kbg, (e_word,), dtype=jnp.float32) * 0.1

    ref = highway_ref(x, w_proj, b_proj, w_gate, b_gate)

    # Performance path: bf16 fused weights (MXU-native); f32 accumulation.
    w_bf16, b_f = pack_highway_params(w_proj, b_proj, w_gate, b_gate)
    out = jax.block_until_ready(highway(x, w_bf16, b_f))
    assert out.shape == (batch, e_word)
    assert jnp.allclose(out, ref, atol=3e-2, rtol=3e-2), "bf16 path mismatch"

    # Exact-math check: same kernel with f32-packed weights.
    w_f32, b_f32 = pack_highway_params(w_proj, b_proj, w_gate, b_gate,
                                       param_dtype=jnp.float32)
    out32 = jax.block_until_ready(highway(x, w_f32, b_f32))
    assert jnp.allclose(out32, ref, atol=1e-5, rtol=1e-5), "f32 path mismatch"

    print("KERNEL_OK")
</pallas_src>

<mosaic_0001>
module attributes {stable_mosaic.version = 11 : i64} {
  func.func @highway_kernel(%arg0: i32, %arg1: memref<8x32xf32, #tpu.memory_space<vmem>>, %arg2: memref<32x256xbf16, #tpu.memory_space<vmem>>, %arg3: memref<1x256xf32, #tpu.memory_space<vmem>>, %arg4: memref<8x32xf32, #tpu.memory_space<vmem>>) attributes {dimension_semantics = [#tpu.dimension_semantics<parallel>], iteration_bounds = array<i64: 1>, scalar_prefetch = 0 : i64, scratch_operands = 0 : i64, tpu.core_type = #tpu.core_type<tc>, window_params = [{transform_indices = @transform_0, window_bounds = array<i64: 8, 32>}, {pipeline_mode = #tpu.pipeline_mode<synchronous>, transform_indices = @transform_1, window_bounds = array<i64: 32, 256>}, {pipeline_mode = #tpu.pipeline_mode<synchronous>, transform_indices = @transform_2, window_bounds = array<i64: 1, 256>}, {transform_indices = @transform_3, window_bounds = array<i64: 8, 32>}]} {
    %c0 = arith.constant 0 : index
    %c0_0 = arith.constant 0 : index
    %0 = vector.load %arg1[%c0, %c0_0] : memref<8x32xf32, #tpu.memory_space<vmem>>, vector<8x32xf32>
    %1 = arith.truncf %0 : vector<8x32xf32> to vector<8x32xbf16>
    %c0_1 = arith.constant 0 : index
    %c0_2 = arith.constant 0 : index
    %2 = vector.load %arg2[%c0_1, %c0_2] : memref<32x256xbf16, #tpu.memory_space<vmem>>, vector<32x256xbf16>
    %cst = arith.constant dense<0.000000e+00> : vector<8x256xf32>
    %3 = tpu.matmul %1, %2, %cst {dimension_numbers = #tpu.dot_dimension_numbers<[1], [0], [0], [1], [0, 0, 1, 1], [], []>} : vector<8x32xbf16>, vector<32x256xbf16>, vector<8x256xf32> -> vector<8x256xf32>
    %c0_3 = arith.constant 0 : index
    %c0_4 = arith.constant 0 : index
    %4 = vector.load %arg3[%c0_3, %c0_4] : memref<1x256xf32, #tpu.memory_space<vmem>>, vector<1x256xf32>
    %5 = vector.broadcast %4 : vector<1x256xf32> to vector<8x256xf32>
    %6 = arith.addf %3, %5 : vector<8x256xf32>
    %7 = vector.extract_strided_slice %6 {offsets = [0, 0], sizes = [8, 32], strides = [1, 1]} : vector<8x256xf32> to vector<8x32xf32>
    %cst_5 = arith.constant 0.000000e+00 : f32
    %8 = vector.broadcast %cst_5 : f32 to vector<8x32xf32>
    %9 = arith.maximumf %7, %8 : vector<8x32xf32>
    %10 = vector.extract_strided_slice %6 {offsets = [0, 128], sizes = [8, 32], strides = [1, 1]} : vector<8x256xf32> to vector<8x32xf32>
    %11 = arith.negf %10 : vector<8x32xf32>
    %12 = math.exp %11 : vector<8x32xf32>
    %cst_6 = arith.constant 1.000000e+00 : f32
    %13 = vector.broadcast %cst_6 : f32 to vector<8x32xf32>
    %14 = arith.addf %13, %12 : vector<8x32xf32>
    %15 = arith.divf %13, %14 : vector<8x32xf32>
    %16 = arith.subf %9, %0 : vector<8x32xf32>
    %17 = arith.mulf %15, %16 : vector<8x32xf32>
    %18 = arith.addf %17, %0 : vector<8x32xf32>
    %c0_7 = arith.constant 0 : index
    %c0_8 = arith.constant 0 : index
    %19 = vector.load %arg4[%c0_7, %c0_8] : memref<8x32xf32, #tpu.memory_space<vmem>>, vector<8x32xf32>
    tpu.vector_store %arg4[%c0_7, %c0_8], %18 {strides = array<i32>} : memref<8x32xf32, #tpu.memory_space<vmem>>, vector<8x32xf32>,
    return
  }
  func.func @transform_0(%arg0: i32) -> (i32, i32) {
    %c0_i32 = arith.constant 0 : i32
    %c0_i32_0 = arith.constant 0 : i32
    return %arg0, %c0_i32 : i32, i32
  }
  func.func @transform_1(%arg0: i32) -> (i32, i32) {
    %c0_i32 = arith.constant 0 : i32
    %c0_i32_0 = arith.constant 0 : i32
    %c0_i32_1 = arith.constant 0 : i32
    return %c0_i32, %c0_i32_0 : i32, i32
  }
  func.func @transform_2(%arg0: i32) -> (i32, i32) {
    %c0_i32 = arith.constant 0 : i32
    %c0_i32_0 = arith.constant 0 : i32
    %c0_i32_1 = arith.constant 0 : i32
    return %c0_i32, %c0_i32_0 : i32, i32
  }
  func.func @transform_3(%arg0: i32) -> (i32, i32) {
    %c0_i32 = arith.constant 0 : i32
    %c0_i32_0 = arith.constant 0 : i32
    return %arg0, %c0_i32 : i32, i32
  }
}

</mosaic_0001>

<bundles_post_ra>
// kernel: highway.1
= control target key start
LH: loop header
LB: loop body
LE: loop exit
PB: predicated region body
PF: predicated region fallthrough
CT: control target
= control target key end

     0   :  { %8 = vsyncpa [#allocation3], 0  ;;  %s280_s0 = inlined_call_operand.hbm [shape: f32[8,32], index: 0, kind: input, shape index: {}]   ;;  %s281_s1 = inlined_call_operand.hbm [shape: bf16[32,256], index: 1, kind: input, shape index: {}]   ;;  %s282_s2 = inlined_call_operand.vmem [shape: f32[1,256], index: 2, kind: input, shape index: {}]   ;;  %s283_s3 = inlined_call_operand.hbm [shape: f32[8,32], index: 3, kind: output, shape index: {}]  }
   0x1   :  { %9 = vsyncpa [#allocation6], 0 }
   0x2   :  { %10 = vsyncpa [#allocation4], 0  ;;  %s240_s12 = smov [#allocation2]   ;;  %s241_s14 = smov [#allocation5]  }
   0x3   :  { %s17_s13 = sshll.u32 %s240_s12, 4  ;;  %s26_s15 = sshll.u32 %s241_s14, 4  ;;  %s18_s13 = int_to_ptr.vmem [resolvable:$true] %s17_s13  ;;  %s27_s15 = int_to_ptr.vmem [resolvable:$true] %s26_s15 }
   0x4   :  { %s182_s16 = scalar_lea.vmem %s18_s13, 128  ;;  %p187_p1 = scmp.lt.s32.totalorder %s18_s13, %s18_s13 }
   0x5   :  { %p183_p0 = scmp.ne.s32.totalorder %s18_s13, %s182_s16  ;;  %p188_p2 = scmp.lt.s32.totalorder %s182_s16, %s182_s16 }
   0x7   :  { %p189_p3 = por %p188_p2, %p187_p1 }
   0x9   :  { %p190_p4 = pnand %p189_p3, %p183_p0 }
   0xb   :  { %193 = shalt.err (!%p190_p4)
}
   0xc   :  { %20 = dma.hbm_to_vmem [thread:$0]  %s280_s0, 128, %s18_s13, [#allocation3]  }
   0xd   :  { %s202_s19 = scalar_lea.vmem %s27_s15, 512  ;;  %p207_p6 = scmp.lt.s32.totalorder %s27_s15, %s27_s15 }
   0xe   :  { %p203_p5 = scmp.ne.s32.totalorder %s27_s15, %s202_s19  ;;  %p208_p7 = scmp.lt.s32.totalorder %s202_s19, %s202_s19 }
  0x10   :  { %p209_p8 = por %p208_p7, %p207_p6 }
  0x12   :  { %p210_p9 = pnand %p209_p8, %p203_p5 }
  0x14   :  { %213 = shalt.err (!%p210_p9)
}
  0x15   :  { %s242_s20 = smov 128   ;;  %s243_s21 = smov 8  }
  0x16   :  { %32 = dma.hbm_to_vmem [thread:$0]  %s281_s1, 512, %s27_s15, [#allocation6], %s242_s20, %s242_s20, %s243_s21  }
  0x17   :  { %234 = dma.done.wait [#allocation3], 128  }
  0x18   :  { %235 = vsyncadd [#allocation3], 4294967168 }
  0x19   :  { %236 = dma.done.wait [#allocation6], 512  }
  0x1a   :  { %237 = vsyncadd [#allocation6], 4294966784  ;;  %v244_v0 = vmov 0   ;;  %v164_v1 = vld [vmem:[#allocation5 + $0x14] ss:$8 sps:$4 sm:$0xff]   ;;  %vm80_vm0 = vcmask 261120   ;;  %v50_v7 = vlaneseq }
  0x1b   :  { %116 = vmatprep.mubr.bf16.mxu0 %v244_v0  ;;  %v166_v2 = vld [vmem:[#allocation5 + $0x10] ss:$8 sps:$4 sm:$0xff]   ;;  %96 = vmatprep.subr.bf16.mxu0 %v164_v1  ;;  %v167_v3 = vld [vmem:[#allocation5 + $0x4] ss:$8 sps:$4 sm:$0xff]   ;;  %v169_v4 = vld [vmem:[#allocation5] ss:$8 sps:$4 sm:$0xff]  }
  0x1c   :  { %97 = vmatpush1.bf16.msra.mxu0 %v166_v2  ;;  %v42_v5 = vld [vmem:[#allocation2] sm:$0xff]  ;;  %v51_v8 = vshrl.u32 %v50_v7, 7  ;;  %s245_s24 = smov [#allocation7]  }
  0x1d   :  { %98 = vmatprep.subr.bf16.mxu0 %v167_v3  ;;  %v43_v6 = vpack.c.bf16 %v42_v5, %v42_v5  ;;  %v48_v10 = vld [vmem:[%s282_s2] sm:$0x3]  ;;  %s142_s25 = sshll.u32 %s245_s24, 4  ;;  %s143_s25 = int_to_ptr.vmem [resolvable:$true] %s142_s25 }
  0x1e   :  { %v56_v9 = vsub.s32 1, %v51_v8  ;;  %v52_v18 = vsub.s32 0, %v51_v8  ;;  %s214_s2 = scalar_lea.vmem %s143_s25, 128  ;;  %p219_p11 = scmp.lt.s32.totalorder %s143_s25, %s143_s25 }
  0x1f   :  { %p215_p10 = scmp.ne.s32.totalorder %s143_s25, %s214_s2  ;;  %p220_p12 = scmp.lt.s32.totalorder %s214_s2, %s214_s2 }
  0x20   :  { %99 = vmatpush1.bf16.msra.mxu0 %v169_v4  ;;  %v57_v11 = vrot.slane %v48_v10, %v56_v9  ;;  %v53_v21 = vrot.slane %v48_v10, %v52_v18 }
  0x21   :  { %p221_p13 = por %p220_p12, %p219_p11 }
  0x23   :  { %156 = vmatmul.mubr.msk.bf16.vlgmr.msra.gmra.mxu0 %vm80_vm0, %v43_v6  ;;  %p222_p0 = pnand %p221_p13, %p215_p10 }
  0xe3   :  { %v118_v12 = vpop.f32.mrf.mxu0 }
  0xe4   :  { %v119_v22 = vadd.f32 %v118_v12, %v53_v21 }
  0xe5   :  { %v120_v13 = vpop.f32.mrf.mxu0 }
  0xe6   :  { %v121_v14 = vadd.f32 %v120_v13, %v57_v11  ;;  %v125_v23 = vmax.f32 %v119_v22, 0.0 }
  0xe7   :  { %v122_v15 = vpop.f32.mrf.mxu0 }
  0xe8   :  { %v157_v16 = vmul.f32 -1.442695, %v121_v14  ;;  %v132_v24 = vsub.f32 %v125_v23, %v42_v5 }
  0xe9   :  { %v123_v17 = vpop.f32.mrf.mxu0 }
  0xea   :  { %170 = vpow2.f32 %v157_v16 }
  0xf7   :  { %v171_v19 = vpop.eup %170 }
  0xf8   :  { %v129_v20 = vadd.f32 1.0, %v171_v19 }
  0xfa   :  { %172 = vrcp.f32 %v129_v20 }
 0x107   :  { %v173_v25 = vpop.eup %172 }
 0x108   :  { %v133_v26 = vmul.f32 %v173_v25, %v132_v24 }
 0x10a   :  { %v134_v27 = vadd.f32 %v133_v26, %v42_v5 }
 0x10c   :  { %135 = vst.msk [vmem:[#allocation7] sm:$0xff] %vm80_vm0, %v134_v27 }
 0x10d   :  { %225 = shalt.err (!%p222_p0)
}
 0x10e   :  { %145 = dma.vmem_to_hbm [thread:$0]  %s143_s25, 128, %s283_s3, [#allocation4]  }
 0x10f   :  { %238 = dma.done.wait [#allocation4], 128  }
 0x110   :  { %239 = vsyncadd [#allocation4], 4294967168 }
 0x111   :  { %149 = vsyncpa [#allocation3], 1 }
 0x112   :  { %150 = vsyncpa [#allocation6], 1 }
 0x113   :  { %151 = vsyncpa [#allocation4], 1 }

</bundles_post_ra>
